<compile_context>
chip_gen: v6e
topology: v6e:2x2x1
jax: 0.10.0
libtpu: 0.0.40
codegen_flags: <defaults>
</compile_context>

<pallas_src>
import jax
import jax.numpy as jnp
from jax.experimental import pallas as pl
from jax.experimental.pallas import tpu as pltpu

N_IN = 28 * 28        # 784
N_HID = 128
N_OUT = 10
N_OUT_PAD = 128       # fc2 padded to a full MXU/lane tile inside the kernel only
TB_MAX = 2048         # max batch-tile rows (f32 x: ~6.4 MiB/buffer, 2 bufs ~13 MiB)
TB_MIN = 16


def _round_up(n, m):
    return ((n + m - 1) // m) * m


def mlp_kernel(x_ref, w1_ref, b1_ref, w2_ref, b2_ref, o_ref):
    # x_ref : (TB, 784)  f32 batch tile (streamed from HBM; cast to bf16 here)
    # w1_ref: (784, 128) bf16 resident      b1_ref: (1, 128) f32 resident
    # w2_ref: (128, 128) bf16 resident (zero-padded cols)  b2_ref: (1, 128) f32
    # o_ref : (TB, 10)   f32 logits (unpadded, masked partial-lane store)
    x = x_ref[...].astype(w1_ref.dtype)                       # in-kernel bf16 cast
    h = jnp.dot(x, w1_ref[...], preferred_element_type=jnp.float32) + b1_ref[...]
    h = jnp.maximum(h, 0.0)                                    # torch.relu
    out = jnp.dot(h.astype(w2_ref.dtype), w2_ref[...],
                  preferred_element_type=jnp.float32) + b2_ref[...]
    o_ref[...] = out[:, :N_OUT].astype(o_ref.dtype)            # drop padded cols


def prepare_params(w1, b1, w2, b2, compute_dtype=jnp.bfloat16):
    """One-time weight prep (hoisted out of the per-forward path).

    w1: (128, 784), b1: (128,), w2: (10, 128), b2: (10,)  -- PyTorch layouts.
    """
    w1t = w1.T.astype(compute_dtype)                              # (784, 128)
    b1r = b1.reshape(1, N_HID).astype(jnp.float32)                # (1, 128)
    w2t = jnp.zeros((N_HID, N_OUT_PAD), compute_dtype)
    w2t = w2t.at[:, :N_OUT].set(w2.T.astype(compute_dtype))       # (128, 128)
    b2r = jnp.zeros((1, N_OUT_PAD), jnp.float32)
    b2r = b2r.at[:, :N_OUT].set(b2.astype(jnp.float32))           # (1, 128)
    return w1t, b1r, w2t, b2r


@jax.jit
def simple_nn_forward(x, w1t, b1r, w2t, b2r):
    """SimpleNN forward: relu(x @ W1^T + b1) @ W2^T + b2 -> (B, 10) f32 logits."""
    x2d = x.reshape(-1, N_IN)          # x.view(-1, 784); stays f32 (cast in-kernel)
    B = x2d.shape[0]

    # Batch tile: multiple of 16, capped at TB_MAX, and chosen so the grid has
    # >=2 steps whenever the batch allows it (keeps both v7x TensorCores busy).
    if B <= 2 * TB_MIN:
        TB = TB_MIN
    else:
        TB = min(TB_MAX, _round_up(pl.cdiv(B, 2), TB_MIN))
    grid = (pl.cdiv(B, TB),)           # last block may be partial: OOB rows are
                                       # garbage, their output writes are masked.

    flops = 2 * B * (N_IN * N_HID + N_HID * N_OUT_PAD)
    bytes_accessed = (
        x2d.size * x2d.dtype.itemsize
        + w1t.size * w1t.dtype.itemsize + w2t.size * w2t.dtype.itemsize
        + b1r.size * 4 + b2r.size * 4
        + B * N_OUT * 4
    )

    return pl.pallas_call(
        mlp_kernel,
        out_shape=jax.ShapeDtypeStruct((B, N_OUT), jnp.float32),
        grid_spec=pltpu.PrefetchScalarGridSpec(
            num_scalar_prefetch=0,
            grid=grid,
            in_specs=[
                pl.BlockSpec((TB, N_IN), lambda i: (i, 0)),        # stream x tiles
                pl.BlockSpec((N_IN, N_HID), lambda i: (0, 0)),     # resident weights
                pl.BlockSpec((1, N_HID), lambda i: (0, 0)),
                pl.BlockSpec((N_HID, N_OUT_PAD), lambda i: (0, 0)),
                pl.BlockSpec((1, N_OUT_PAD), lambda i: (0, 0)),
            ],
            out_specs=pl.BlockSpec((TB, N_OUT), lambda i: (i, 0)), # unpadded logits
        ),
        compiler_params=pltpu.CompilerParams(
            dimension_semantics=("parallel",),   # shard batch tiles over v7x's 2 TCs
            vmem_limit_bytes=32 * 1024 * 1024,   # big f32 x tiles also fit on v5e
        ),
        cost_estimate=pl.CostEstimate(
            flops=flops, transcendentals=0, bytes_accessed=bytes_accessed),
    )(x2d, w1t, b1r, w2t, b2r)


def _init_params(key):
    # Deterministic init mimicking nn.Linear's uniform(-1/sqrt(fan_in), 1/sqrt(fan_in)).
    k1, k2, k3, k4 = jax.random.split(key, 4)
    lim1 = 1.0 / jnp.sqrt(784.0)
    lim2 = 1.0 / jnp.sqrt(128.0)
    w1 = jax.random.uniform(k1, (128, 784), jnp.float32, -lim1, lim1)
    b1 = jax.random.uniform(k2, (128,), jnp.float32, -lim1, lim1)
    w2 = jax.random.uniform(k3, (10, 128), jnp.float32, -lim2, lim2)
    b2 = jax.random.uniform(k4, (10,), jnp.float32, -lim2, lim2)
    return w1, b1, w2, b2


if __name__ == "__main__":
    key = jax.random.PRNGKey(0)
    kx, kp = jax.random.split(key)
    # Small MNIST-like batch: (B, 1, 28, 28)
    x = jax.random.normal(kx, (2, 1, 28, 28), jnp.float32)
    w1, b1, w2, b2 = _init_params(kp)

    params = prepare_params(w1, b1, w2, b2, compute_dtype=jnp.bfloat16)

    out = simple_nn_forward(x, *params)
    out = jax.block_until_ready(out)
    assert out.shape == (2, 10) and out.dtype == jnp.float32

    # bf16-matched reference (same rounding as the kernel's MXU path).
    x2d = x.reshape(-1, N_IN)
    xb = x2d.astype(jnp.bfloat16)
    w1b = w1.T.astype(jnp.bfloat16)
    w2b = w2.T.astype(jnp.bfloat16)
    h = jnp.maximum(jnp.dot(xb, w1b, preferred_element_type=jnp.float32) + b1, 0.0)
    ref_bf16 = jnp.dot(h.astype(jnp.bfloat16), w2b,
                       preferred_element_type=jnp.float32) + b2
    # Full-f32 reference (original PyTorch semantics).
    ref_f32 = jnp.maximum(x2d @ w1.T + b1, 0.0) @ w2.T + b2

    assert jnp.allclose(out, ref_bf16, atol=1e-2, rtol=1e-2), "mismatch vs bf16 ref"
    assert jnp.allclose(out, ref_f32, atol=5e-2, rtol=5e-2), "mismatch vs f32 ref"

    # Exercise the multi-tile grid with a ragged final block (B % TB != 0, no pad).
    xg = jax.random.normal(kx, (1030, 1, 28, 28), jnp.float32)
    outg = jax.block_until_ready(simple_nn_forward(xg, *params))
    hg = jnp.maximum(jnp.dot(xg.reshape(-1, N_IN).astype(jnp.bfloat16), w1b,
                             preferred_element_type=jnp.float32) + b1, 0.0)
    refg = jnp.dot(hg.astype(jnp.bfloat16), w2b,
                   preferred_element_type=jnp.float32) + b2
    assert outg.shape == (1030, 10)
    assert jnp.allclose(outg, refg, atol=1e-2, rtol=1e-2), "mismatch vs bf16 ref (tiled)"

    print("KERNEL_OK")
</pallas_src>

<mosaic_0001>
module attributes {stable_mosaic.version = 11 : i64} {
  func.func @mlp_kernel(%arg0: i32, %arg1: memref<16x784xf32, #tpu.memory_space<vmem>>, %arg2: memref<784x128xbf16, #tpu.memory_space<vmem>>, %arg3: memref<1x128xf32, #tpu.memory_space<vmem>>, %arg4: memref<128x128xbf16, #tpu.memory_space<vmem>>, %arg5: memref<1x128xf32, #tpu.memory_space<vmem>>, %arg6: memref<16x10xf32, #tpu.memory_space<vmem>>) attributes {dimension_semantics = [#tpu.dimension_semantics<parallel>], iteration_bounds = array<i64: 1>, scalar_prefetch = 0 : i64, scratch_operands = 0 : i64, tpu.core_type = #tpu.core_type<tc>, window_params = [{transform_indices = @transform_0, window_bounds = array<i64: 16, 784>}, {pipeline_mode = #tpu.pipeline_mode<synchronous>, transform_indices = @transform_1, window_bounds = array<i64: 784, 128>}, {pipeline_mode = #tpu.pipeline_mode<synchronous>, transform_indices = @transform_2, window_bounds = array<i64: 1, 128>}, {pipeline_mode = #tpu.pipeline_mode<synchronous>, transform_indices = @transform_3, window_bounds = array<i64: 128, 128>}, {pipeline_mode = #tpu.pipeline_mode<synchronous>, transform_indices = @transform_4, window_bounds = array<i64: 1, 128>}, {transform_indices = @transform_5, window_bounds = array<i64: 16, 10>}]} {
    %c0 = arith.constant 0 : index
    %c0_0 = arith.constant 0 : index
    %0 = vector.load %arg1[%c0, %c0_0] : memref<16x784xf32, #tpu.memory_space<vmem>>, vector<16x784xf32>
    %1 = arith.truncf %0 : vector<16x784xf32> to vector<16x784xbf16>
    %c0_1 = arith.constant 0 : index
    %c0_2 = arith.constant 0 : index
    %2 = vector.load %arg2[%c0_1, %c0_2] : memref<784x128xbf16, #tpu.memory_space<vmem>>, vector<784x128xbf16>
    %cst = arith.constant dense<0.000000e+00> : vector<16x128xf32>
    %3 = tpu.matmul %1, %2, %cst {dimension_numbers = #tpu.dot_dimension_numbers<[1], [0], [0], [1], [0, 0, 1, 1], [], []>} : vector<16x784xbf16>, vector<784x128xbf16>, vector<16x128xf32> -> vector<16x128xf32>
    %c0_3 = arith.constant 0 : index
    %c0_4 = arith.constant 0 : index
    %4 = vector.load %arg3[%c0_3, %c0_4] : memref<1x128xf32, #tpu.memory_space<vmem>>, vector<1x128xf32>
    %5 = vector.broadcast %4 : vector<1x128xf32> to vector<16x128xf32>
    %6 = arith.addf %3, %5 : vector<16x128xf32>
    %cst_5 = arith.constant 0.000000e+00 : f32
    %7 = vector.broadcast %cst_5 : f32 to vector<16x128xf32>
    %8 = arith.maximumf %6, %7 : vector<16x128xf32>
    %9 = arith.truncf %8 : vector<16x128xf32> to vector<16x128xbf16>
    %c0_6 = arith.constant 0 : index
    %c0_7 = arith.constant 0 : index
    %10 = vector.load %arg4[%c0_6, %c0_7] : memref<128x128xbf16, #tpu.memory_space<vmem>>, vector<128x128xbf16>
    %cst_8 = arith.constant dense<0.000000e+00> : vector<16x128xf32>
    %11 = tpu.matmul %9, %10, %cst_8 {dimension_numbers = #tpu.dot_dimension_numbers<[1], [0], [0], [1], [0, 0, 1, 1], [], []>} : vector<16x128xbf16>, vector<128x128xbf16>, vector<16x128xf32> -> vector<16x128xf32>
    %c0_9 = arith.constant 0 : index
    %c0_10 = arith.constant 0 : index
    %12 = vector.load %arg5[%c0_9, %c0_10] : memref<1x128xf32, #tpu.memory_space<vmem>>, vector<1x128xf32>
    %13 = vector.broadcast %12 : vector<1x128xf32> to vector<16x128xf32>
    %14 = arith.addf %11, %13 : vector<16x128xf32>
    %15 = vector.extract_strided_slice %14 {offsets = [0, 0], sizes = [16, 10], strides = [1, 1]} : vector<16x128xf32> to vector<16x10xf32>
    %c0_11 = arith.constant 0 : index
    %c0_12 = arith.constant 0 : index
    %16 = vector.load %arg6[%c0_11, %c0_12] : memref<16x10xf32, #tpu.memory_space<vmem>>, vector<16x10xf32>
    tpu.vector_store %arg6[%c0_11, %c0_12], %15 {strides = array<i32>} : memref<16x10xf32, #tpu.memory_space<vmem>>, vector<16x10xf32>,
    return
  }
  func.func @transform_0(%arg0: i32) -> (i32, i32) {
    %c0_i32 = arith.constant 0 : i32
    %c0_i32_0 = arith.constant 0 : i32
    return %arg0, %c0_i32 : i32, i32
  }
  func.func @transform_1(%arg0: i32) -> (i32, i32) {
    %c0_i32 = arith.constant 0 : i32
    %c0_i32_0 = arith.constant 0 : i32
    %c0_i32_1 = arith.constant 0 : i32
    return %c0_i32, %c0_i32_0 : i32, i32
  }
  func.func @transform_2(%arg0: i32) -> (i32, i32) {
    %c0_i32 = arith.constant 0 : i32
    %c0_i32_0 = arith.constant 0 : i32
    %c0_i32_1 = arith.constant 0 : i32
    return %c0_i32, %c0_i32_0 : i32, i32
  }
  func.func @transform_3(%arg0: i32) -> (i32, i32) {
    %c0_i32 = arith.constant 0 : i32
    %c0_i32_0 = arith.constant 0 : i32
    %c0_i32_1 = arith.constant 0 : i32
    return %c0_i32, %c0_i32_0 : i32, i32
  }
  func.func @transform_4(%arg0: i32) -> (i32, i32) {
    %c0_i32 = arith.constant 0 : i32
    %c0_i32_0 = arith.constant 0 : i32
    %c0_i32_1 = arith.constant 0 : i32
    return %c0_i32, %c0_i32_0 : i32, i32
  }
  func.func @transform_5(%arg0: i32) -> (i32, i32) {
    %c0_i32 = arith.constant 0 : i32
    %c0_i32_0 = arith.constant 0 : i32
    return %arg0, %c0_i32 : i32, i32
  }
}

</mosaic_0001>

<bundles_post_ra>
// kernel: simple_nn_forward.1
= control target key start
LH: loop header
LB: loop body
LE: loop exit
PB: predicated region body
PF: predicated region fallthrough
CT: control target
= control target key end

     0   :  { %10 = vsyncpa [#allocation3], 0  ;;  %s1384_s0 = inlined_call_operand.vmem [shape: f32[2,784], index: 0, kind: input, shape index: {}]   ;;  %s1385_s1 = inlined_call_operand.hbm [shape: bf16[784,128], index: 1, kind: input, shape index: {}]   ;;  %s1386_s2 = inlined_call_operand.vmem [shape: f32[1,128], index: 2, kind: input, shape index: {}]   ;;  %s1387_s3 = inlined_call_operand.vmem [shape: bf16[128,128], index: 3, kind: input, shape index: {}]   ;;  %s1388_s4 = inlined_call_operand.vmem [shape: f32[1,128], index: 4, kind: input, shape index: {}]   ;;  %s1389_s5 = inlined_call_operand.hbm [shape: f32[2,10], index: 5, kind: output, shape index: {}]  }
   0x1   :  { %11 = vsyncpa [#allocation4], 0  ;;  %s1230_s18 = smov [#allocation2]  }
   0x2   :  { %s19_s19 = sshll.u32 %s1230_s18, 4  ;;  %s20_s19 = int_to_ptr.vmem [resolvable:$true] %s19_s19 }
   0x3   :  { %s1194_s20 = scalar_lea.vmem %s20_s19, 6272  ;;  %p1199_p1 = scmp.lt.s32.totalorder %s20_s19, %s20_s19 }
   0x4   :  { %p1195_p0 = scmp.ne.s32.totalorder %s20_s19, %s1194_s20  ;;  %p1200_p2 = scmp.lt.s32.totalorder %s1194_s20, %s1194_s20 }
   0x6   :  { %p1201_p3 = por %p1200_p2, %p1199_p1 }
   0x8   :  { %p1202_p4 = pnand %p1201_p3, %p1195_p0 }
   0xa   :  { %1205 = shalt.err (!%p1202_p4)
}
   0xb   :  { %s1231_s21 = smov 64   ;;  %s1232_s22 = smov 4  }
   0xc   :  { %25 = dma.hbm_to_vmem [thread:$0]  %s1385_s1, 6272, %s20_s19, [#allocation3], %s1231_s21, %s1231_s21, %s1232_s22  }
   0xd   :  { %1226 = dma.done.wait [#allocation3], 6272  }
   0xe   :  { %1227 = vsyncadd [#allocation3], 4294961024  ;;  %v1105_v0 = vld [vmem:[#allocation2 + $0x78] sm:$0xff]   ;;  %v1109_v4 = vld [vmem:[#allocation2 + $0x70] sm:$0xff]   ;;  %v1233_v24 = vmov 1983009808   ;;  %v75_v26 = vlaneseq }
   0xf   :  { %v1106_v1 = vld [vmem:[#allocation2 + $0x38] sm:$0xff]   ;;  %993 = vmatprep.subr.bf16.mxu0 %v1105_v0  ;;  %v1110_v5 = vld [vmem:[#allocation2 + $0x30] sm:$0xff]   ;;  %v1113_v8 = vld [vmem:[#allocation2 + $0x68] sm:$0xff]   ;;  %v73_v25 = vunpack.c.l.s4 %v1233_v24  ;;  %v1234_v58 = vmov 0.0   ;;  %vm1235_vm0 = vmmov 0   ;;  %vm630_vm1 = vcmask 130048  }
  0x10   :  { %v1107_v2 = vld [vmem:[#allocation2 + $0xf8] sm:$0xff]   ;;  %994 = vmatpush3.bf16.msra.mxu0 %v1106_v1  ;;  %v1111_v6 = vld [vmem:[#allocation2 + $0xf0] sm:$0xff]   ;;  %v1114_v9 = vld [vmem:[#allocation2 + $0x28] sm:$0xff]   ;;  %v76_v32 = vshrl.u32 %v75_v26, 7  ;;  %vm913_vm2 = vcmask 80896  }
  0x11   :  { %v1108_v3 = vld [vmem:[#allocation2 + $0xb8] sm:$0xff]   ;;  %1015 = vmatprep.subr.bf16.mxu1 %v1107_v2  ;;  %995 = vmatprep.subr.bf16.mxu0 %v1109_v4  ;;  %v1112_v7 = vld [vmem:[#allocation2 + $0xb0] sm:$0xff]   ;;  %v1115_v10 = vld [vmem:[#allocation2 + $0xe8] sm:$0xff]   ;;  %v74_v31 = vunpack.c.0.s8 %v73_v25 }
  0x12   :  { %1016 = vmatpush3.bf16.msra.mxu1 %v1108_v3  ;;  %v1116_v11 = vld [vmem:[#allocation2 + $0xa8] sm:$0xff]   ;;  %v1117_v12 = vld [vmem:[#allocation2 + $0x60] sm:$0xff]   ;;  %v1121_v16 = vld [vmem:[#allocation2 + $0x58] sm:$0xff]  }
  0x13   :  { %1017 = vmatprep.subr.bf16.mxu1 %v1111_v6  ;;  %v1118_v13 = vld [vmem:[#allocation2 + $0x20] sm:$0xff]   ;;  %v1122_v17 = vld [vmem:[#allocation2 + $0x18] sm:$0xff]   ;;  %v1125_v20 = vld [vmem:[#allocation2 + $0x50] sm:$0xff]   ;;  %v1272_v36 = vsub.s32 %v74_v31, %v76_v32 }
  0x14   :  { %996 = vmatpush3.bf16.msra.mxu0 %v1110_v5  ;;  %v1119_v14 = vld [vmem:[#allocation2 + $0xe0] sm:$0xff]   ;;  %v1123_v18 = vld [vmem:[#allocation2 + $0xd8] sm:$0xff]   ;;  %v1126_v21 = vld [vmem:[#allocation2 + $0x10] sm:$0xff]  }
  0x15   :  { %997 = vmatprep.subr.bf16.mxu0 %v1113_v8  ;;  %v1120_v15 = vld [vmem:[#allocation2 + $0xa0] sm:$0xff]   ;;  %v1124_v19 = vld [vmem:[#allocation2 + $0x98] sm:$0xff]   ;;  %v1127_v22 = vld [vmem:[#allocation2 + $0xd0] sm:$0xff]  }
  0x16   :  { %1018 = vmatpush3.bf16.msra.mxu1 %v1112_v7  ;;  %v1128_v23 = vld [vmem:[#allocation2 + $0x90] sm:$0xff]   ;;  %v1129_v27 = vld [vmem:[#allocation2 + $0x48] sm:$0xff]   ;;  %v1133_v33 = vld [vmem:[#allocation2 + $0x40] sm:$0xff]  }
  0x17   :  { %1019 = vmatprep.subr.bf16.mxu1 %v1115_v10  ;;  %v1130_v28 = vld [vmem:[#allocation2 + $0x8] sm:$0xff]   ;;  %v1134_v34 = vld [vmem:[#allocation2] sm:$0xff]   ;;  %v1145_v46 = vld [vmem:[#allocation2 + $0x178] sm:$0xff]  }
  0x18   :  { %998 = vmatpush3.bf16.msra.mxu0 %v1114_v9  ;;  %v1131_v29 = vld [vmem:[#allocation2 + $0xc8] sm:$0xff]   ;;  %v1135_v35 = vld [vmem:[#allocation2 + $0xc0] sm:$0xff]   ;;  %v1150_v62 = vld [vmem:[#allocation2 + $0x138] sm:$0xff]  }
  0x19   :  { %999 = vmatprep.subr.bf16.mxu0 %v1117_v12  ;;  %v1132_v30 = vld [vmem:[#allocation2 + $0x88] sm:$0xff]   ;;  %v1142_v40 = vld [vmem:[%s1384_s0 + $0x54] ss:$14 sps:$4 sm:$0xff]   ;;  %v1158_v12 = vld [vmem:[#allocation2 + $0x118] sm:$0xff]  }
  0x1a   :  { %1020 = vmatpush3.bf16.msra.mxu1 %v1116_v11  ;;  %v1136_v37 = vld [vmem:[%s1384_s0] ss:$14 sps:$4 sm:$0xff]   ;;  %v1138_v38 = vld [vmem:[%s1384_s0 + $0x1c] ss:$14 sps:$4 sm:$0xff]   ;;  %v1140_v39 = vld [vmem:[%s1384_s0 + $0x38] ss:$14 sps:$4 sm:$0xff]   ;;  %v163_v45 = vrot.slane %v1142_v40, %v1272_v36 }
  0x1b   :  { %1021 = vmatprep.subr.bf16.mxu1 %v1119_v14  ;;  %v78_v41 = vrot.slane %v1136_v37, %v1272_v36  ;;  %v1144_v42 = vld [vmem:[#allocation2 + $0x80] sm:$0xff]   ;;  %v92_v43 = vrot.slane %v1138_v38, %v1272_v36  ;;  %v149_v44 = vrot.slane %v1140_v39, %v1272_v36  ;;  %v1148_v49 = vld [vmem:[%s1384_s0 + $0x3c] ss:$14 sps:$4 sm:$0xff]   ;;  %v1151_v1 = vld [vmem:[#allocation2 + $0x170] sm:$0xff]  }
  0x1c   :  { %1000 = vmatpush3.bf16.msra.mxu0 %v1118_v13  ;;  %v1146_v47 = vld [vmem:[%s1384_s0 + $0x4] ss:$14 sps:$4 sm:$0xff]   ;;  %v1147_v48 = vld [vmem:[%s1384_s0 + $0x20] ss:$14 sps:$4 sm:$0xff]   ;;  %v156_v57 = vrot.slane %v1148_v49, %v1272_v36  ;;  %v1157_v11 = vld [vmem:[#allocation2 + $0x158] sm:$0xff]  }
  0x1d   :  { %1001 = vmatprep.subr.bf16.mxu0 %v1121_v16  ;;  %v101_v50 = vcombine.high %v78_v41, %v92_v43  ;;  %v172_v51 = vcombine.high %v149_v44, %v163_v45  ;;  %v100_v52 = vcombine.low %v78_v41, %v92_v43  ;;  %v171_v53 = vcombine.low %v149_v44, %v163_v45  ;;  %v1149_v54 = vld [vmem:[%s1384_s0 + $0x58] ss:$14 sps:$4 sm:$0xff]   ;;  %v1152_v6 = vld [vmem:[#allocation2 + $0x130] sm:$0xff]  }
  0x1e   :  { %1022 = vmatpush3.bf16.msra.mxu1 %v1120_v15  ;;  %v85_v55 = vrot.slane %v1146_v47, %v1272_v36  ;;  %v99_v56 = vrot.slane %v1147_v48, %v1272_v36  ;;  %v170_v61 = vrot.slane %v1149_v54, %v1272_v36  ;;  %v1153_v7 = vld [vmem:[#allocation2 + $0x168] sm:$0xff]   ;;  %v1155_v9 = vld [vmem:[#allocation2 + $0x160] sm:$0xff]   ;;  %v1159_v14 = vld [vmem:[#allocation2 + $0x150] sm:$0xff]  }
  0x1f   :  { %1023 = vmatprep.subr.bf16.mxu1 %v1123_v18  ;;  %v225_v59 = vpack.c.bf16 %v172_v51, %v101_v50  ;;  %v224_v60 = vpack.c.bf16 %v171_v53, %v100_v52  ;;  %v1154_v8 = vld [vmem:[#allocation2 + $0x128] sm:$0xff]   ;;  %v1156_v10 = vld [vmem:[#allocation2 + $0x120] sm:$0xff]   ;;  %v1178_v45 = vld [vmem:[%s1387_s3 + $0x38] sm:$0xff]  }
  0x20   :  { %1002 = vmatpush3.bf16.msra.mxu0 %v1122_v17  ;;  %v103_v63 = vcombine.high %v85_v55, %v99_v56  ;;  %v102_v0 = vcombine.low %v85_v55, %v99_v56  ;;  %v174_v2 = vcombine.high %v156_v57, %v170_v61  ;;  %v173_v3 = vcombine.low %v156_v57, %v170_v61  ;;  %v1165_v13 = vld [vmem:[#allocation2 + $0x180] sm:$0xff]   ;;  %v1166_v15 = vld [vmem:[%s1384_s0 + $0x8] ss:$14 sps:$4 sm:$0xff]   ;;  %v1168_v16 = vld [vmem:[%s1384_s0 + $0xc] ss:$14 sps:$4 sm:$0x33]  }
  0x21   :  { %1003 = vmatprep.subr.bf16.mxu0 %v1125_v20  ;;  %666 = vmatprep.mubr.bf16.mxu0 %v225_v59  ;;  %v1169_v17 = vld [vmem:[%s1384_s0 + $0x24] ss:$14 sps:$4 sm:$0xff]   ;;  %v1171_v18 = vld [vmem:[%s1384_s0 + $0x28] ss:$14 sps:$4 sm:$0x33]   ;;  %v114_v20 = vrot.slane %v1166_v15, %v1272_v36  ;;  %v1182_v49 = vld [vmem:[%s1387_s3 + $0x18] sm:$0xff]  }
  0x22   :  { %1024 = vmatpush3.bf16.msra.mxu1 %v1124_v19  ;;  %v227_v4 = vpack.c.bf16 %v174_v2, %v103_v63  ;;  %v226_v5 = vpack.c.bf16 %v173_v3, %v102_v0  ;;  %v1160_v19 = vld [vmem:[#allocation2 + $0x110] sm:$0xff]   ;;  %v1161_v24 = vld [vmem:[#allocation2 + $0x148] sm:$0xff]   ;;  %v128_v25 = vrot.slane %v1169_v17, %v1272_v36  ;;  %v135_v26 = vrot.slane %v1171_v18, %v1272_v36  ;;  %v1164_v44 = vld [vmem:[#allocation2 + $0x100] sm:$0xff]  }
  0x23   :  { %1025 = vmatprep.subr.bf16.mxu1 %v1127_v22  ;;  %v1172_v22 = vld [vmem:[%s1384_s0 + $0x40] ss:$14 sps:$4 sm:$0xff]  }
  0x24   :  { %1004 = vmatpush3.bf16.msra.mxu0 %v1126_v21  ;;  %707 = vmatprep.mubr.bf16.mxu1 %v227_v4  ;;  %v121_v21 = vrot.slane %v1168_v16, %v1272_v36  ;;  %v1162_v31 = vld [vmem:[#allocation2 + $0x108] sm:$0xff]   ;;  %v137_v32 = vcombine.high %v114_v20, %v128_v25  ;;  %v1181_v48 = vld [vmem:[%s1387_s3 + $0x20] sm:$0xff]   ;;  %v1183_v50 = vld [vmem:[%s1387_s3 + $0x10] sm:$0xff]  }
  0x25   :  { %1005 = vmatprep.subr.bf16.mxu0 %v1129_v27  ;;  %v1175_v27 = vld [vmem:[%s1384_s0 + $0x5c] ss:$14 sps:$4 sm:$0xff]   ;;  %v1185_v52 = vld [vmem:[%s1387_s3] sm:$0xff]  }
  0x26   :  { %1026 = vmatpush3.bf16.msra.mxu1 %v1128_v23  ;;  %v1174_v23 = vld [vmem:[%s1384_s0 + $0x44] ss:$14 sps:$4 sm:$0x33]   ;;  %v138_v37 = vcombine.low %v121_v21, %v135_v26  ;;  %v1180_v47 = vld [vmem:[%s1387_s3 + $0x28] sm:$0xff]   ;;  %v933_v63 = vld [vmem:[%s1386_s2] ss:$0 sm:$0xff] }
  0x27   :  { %1027 = vmatprep.subr.bf16.mxu1 %v1131_v29  ;;  %v185_v29 = vrot.slane %v1172_v22, %v1272_v36  ;;  %v1184_v51 = vld [vmem:[%s1387_s3 + $0x8] sm:$0xff]  }
  0x28   :  { %1006 = vmatpush3.bf16.msra.mxu0 %v1130_v28  ;;  %v1177_v28 = vld [vmem:[%s1384_s0 + $0x60] ss:$14 sps:$4 sm:$0x33]  }
  0x29   :  { %1007 = vmatprep.subr.bf16.mxu0 %v1133_v33  ;;  %v199_v33 = vrot.slane %v1175_v27, %v1272_v36 }
  0x2a   :  { %1028 = vmatpush3.bf16.msra.mxu1 %v1132_v30  ;;  %v192_v30 = vrot.slane %v1174_v23, %v1272_v36  ;;  %v984_v23 = vld [vmem:[%s1388_s4] ss:$0 sm:$0xff] }
  0x2b   :  { %1029 = vmatprep.subr.bf16.mxu1 %v1135_v35  ;;  %v1163_v35 = vld [vmem:[#allocation2 + $0x140] sm:$0xff]   ;;  %v208_v38 = vcombine.high %v185_v29, %v199_v33  ;;  %v207_v43 = vcombine.low %v185_v29, %v199_v33 }
  0x2c   :  { %1008 = vmatpush3.bf16.msra.mxu0 %v1134_v34  ;;  %v206_v34 = vrot.slane %v1177_v28, %v1272_v36 }
  0x2d   :  { %1037 = vmatprep.subr.bf16.mxu0 %v1145_v46  ;;  %v229_v40 = vpack.c.bf16 %v208_v38, %v137_v32  ;;  %v1179_v46 = vld [vmem:[%s1387_s3 + $0x30] sm:$0xff]  }
  0x2e   :  { %1030 = vmatpush3.bf16.msra.mxu1 %v1144_v42  ;;  %v209_v39 = vcombine.low %v192_v30, %v206_v34  ;;  %v136_v42 = vcombine.low %v114_v20, %v128_v25 }
  0x2f   :  { %1070 = vmatprep.subr.bf16.mxu1 %v1234_v58  ;;  %667 = vmatmul.mubr.bf16.vlgmr.msra.gmra.mxu0 %v224_v60 }
  0x30   :  { %1038 = vmatpush3.bf16.msra.mxu0 %v1150_v62  ;;  %v230_v41 = vpack.c.bf16 %v209_v39, %v138_v37  ;;  %748 = vmatprep.mubr.bf16.mxu0 %v229_v40  ;;  %v228_v36 = vpack.c.bf16 %v207_v43, %v136_v42 }
  0x31   :  { %1039 = vmatprep.subr.bf16.mxu0 %v1151_v1  ;;  %708 = vmatmul.mubr.bf16.vlgmr.msra.gmra.mxu1 %v226_v5 }
  0x32   :  { %1072 = vmatprep.mubr.msk.bf16.mxu1 %vm1235_vm0, %v1234_v58  ;;  %1071 = vmatpush3.bf16.msra.mxu1 %v1165_v13 }
  0x33   :  { %1076 = vmatprep.subr.bf16.mxu1 %v1234_v58 }
  0x34   :  { %1040 = vmatpush3.bf16.msra.mxu0 %v1152_v6 }
  0x35   :  { %1041 = vmatprep.subr.bf16.mxu0 %v1153_v7 }
  0x38   :  { %1042 = vmatpush3.bf16.msra.mxu0 %v1154_v8 }
  0x39   :  { %1043 = vmatprep.subr.bf16.mxu0 %v1155_v9  ;;  %1073 = vmatmul.mubr.msk.bf16.vlgmr.msra.gmra.mxu1 %vm630_vm1, %v230_v41 }
  0x3a   :  { %1092 = vmatprep.mubr.msk.bf16.mxu1 %vm1235_vm0, %v1234_v58  ;;  %1077 = vmatpush3.bf16.msra.mxu1 %v1178_v45 }
  0x3b   :  { %1078 = vmatprep.subr.bf16.mxu1 %v1234_v58 }
  0x3c   :  { %1044 = vmatpush3.bf16.msra.mxu0 %v1156_v10 }
  0x3d   :  { %1045 = vmatprep.subr.bf16.mxu0 %v1157_v11 }
  0x3e   :  { %1079 = vmatpush3.bf16.msra.mxu1 %v1179_v46 }
  0x3f   :  { %1080 = vmatprep.subr.bf16.mxu1 %v1234_v58 }
  0x40   :  { %1046 = vmatpush3.bf16.msra.mxu0 %v1158_v12 }
  0x41   :  { %1047 = vmatprep.subr.bf16.mxu0 %v1159_v14 }
  0x42   :  { %1081 = vmatpush3.bf16.msra.mxu1 %v1180_v47 }
  0x43   :  { %1082 = vmatprep.subr.bf16.mxu1 %v1234_v58 }
  0x44   :  { %1048 = vmatpush3.bf16.msra.mxu0 %v1160_v19 }
  0x45   :  { %1049 = vmatprep.subr.bf16.mxu0 %v1161_v24 }
  0x46   :  { %1083 = vmatpush3.bf16.msra.mxu1 %v1181_v48 }
  0x47   :  { %1084 = vmatprep.subr.bf16.mxu1 %v1234_v58 }
  0x48   :  { %1050 = vmatpush3.bf16.msra.mxu0 %v1162_v31 }
  0x49   :  { %1051 = vmatprep.subr.bf16.mxu0 %v1163_v35 }
  0x4a   :  { %1085 = vmatpush3.bf16.msra.mxu1 %v1182_v49 }
  0x4b   :  { %1086 = vmatprep.subr.bf16.mxu1 %v1234_v58 }
  0x4c   :  { %1052 = vmatpush3.bf16.msra.mxu0 %v1164_v44 }
  0x4e   :  { %1087 = vmatpush3.bf16.msra.mxu1 %v1183_v50 }
  0x4f   :  { %749 = vmatmul.mubr.bf16.vlgmr.msra.gmra.mxu0 %v228_v36  ;;  %1088 = vmatprep.subr.bf16.mxu1 %v1234_v58 }
  0x52   :  { %1089 = vmatpush3.bf16.msra.mxu1 %v1184_v51 }
  0x53   :  { %1090 = vmatprep.subr.bf16.mxu1 %v1234_v58 }
  0x56   :  { %1091 = vmatpush3.bf16.msra.mxu1 %v1185_v52 }
  0xef   :  { %v1009_v54 = vpop.f32.mrf.mxu0 }
  0xf1   :  { %v1031_v53 = vpop.f32.mrf.mxu1  ;;  %v1010_v56 = vpop.f32.mrf.mxu0 }
  0xf2   :  { %v1011_v62 = vadd.f32 %v1010_v56, %v1009_v54 }
  0xf3   :  { %v1032_v55 = vpop.f32.mrf.mxu1  ;;  %v1012_v59 = vpop.f32.mrf.mxu0 }
  0xf4   :  { %v669_v2 = vadd.f32 %v1011_v62, %v933_v63  ;;  %v1033_v3 = vadd.f32 %v1032_v55, %v1031_v53 }
  0xf5   :  { %v1034_v57 = vpop.f32.mrf.mxu1  ;;  %v1013_v0 = vpop.f32.mrf.mxu0 }
  0xf6   :  { %v1014_v4 = vadd.f32 %v1013_v0, %v1012_v59  ;;  %v710_v8 = vadd.f32 %v1033_v3, %v669_v2 }
  0xf7   :  { %v1035_v60 = vpop.f32.mrf.mxu1 }
  0xf8   :  { %v672_v9 = vadd.f32 %v1014_v4, %v933_v63  ;;  %v1036_v10 = vadd.f32 %v1035_v60, %v1034_v57 }
  0xf9   :  { %v791_v61 = vpop.f32.mrf.mxu1 }
  0xfa   :  { %v713_v15 = vadd.f32 %v1036_v10, %v672_v9 }
  0xfb   :  { %v1074_v58 = vpop.f32.mrf.mxu1 }
  0xfd   :  { %v794_v1 = vpop.f32.mrf.mxu1 }
  0xff   :  { %v1075_v6 = vpop.f32.mrf.mxu1 }
 0x10f   :  { %v1053_v5 = vpop.f32.mrf.mxu0 }
 0x111   :  { %v1054_v7 = vpop.f32.mrf.mxu0 }
 0x112   :  { %v1055_v11 = vadd.f32 %v1054_v7, %v1053_v5 }
 0x113   :  { %v1056_v12 = vpop.f32.mrf.mxu0 }
 0x114   :  { %v751_v13 = vadd.f32 %v1055_v11, %v710_v8 }
 0x115   :  { %v1057_v14 = vpop.f32.mrf.mxu0 }
 0x116   :  { %v1058_v16 = vadd.f32 %v1057_v14, %v1056_v12  ;;  %v792_v17 = vadd.f32 %v791_v61, %v751_v13 }
 0x118   :  { %v754_v18 = vadd.f32 %v1058_v16, %v713_v15  ;;  %v798_v20 = vmax.f32 %v792_v17, 0.0 }
 0x11a   :  { %v795_v19 = vadd.f32 %v794_v1, %v754_v18 }
 0x11c   :  { %v799_v21 = vmax.f32 %v795_v19, 0.0 }
 0x11e   :  { %v800_v22 = vpack.c.bf16 %v799_v21, %v798_v20 }
 0x120   :  { %1093 = vmatmul.mubr.bf16.vlgmr.msra.gmra.mxu1 %v800_v22 }
 0x1e0   :  { %v906_v24 = vpop.f32.mrf.mxu1 }
 0x1e1   :  { %v907_v25 = vadd.f32 %v984_v23, %v906_v24 }
 0x1e2   :  { %v1094_v26 = vpop.f32.mrf.mxu1 }
 0x1e3   :  { %914 = vst.msk [vmem:[#allocation5] sm:$0xff] %vm913_vm2, %v907_v25 }
 0x1e4   :  { %v909_v27 = vpop.f32.mrf.mxu1 }
 0x1e5   :  { %v910_v28 = vadd.f32 %v984_v23, %v909_v27 }
 0x1e6   :  { %v1095_v29 = vpop.f32.mrf.mxu1 }
 0x1e7   :  { %915 = vst.msk [vmem:[#allocation5 + $0x8] sm:$0xff] %vm913_vm2, %v910_v28 }
 0x1e8   :  { %920 = vsyncadd [#allocation4], 224  ;;  %s1236_s22 = smov [#allocation5]  }
 0x1e9   :  { %s921_s23 = sshll.u32 %s1236_s22, 4  ;;  %s922_s23 = int_to_ptr.vmem [resolvable:$true] %s921_s23 }
 0x1ea   :  { %s1206_s24 = scalar_lea.vmem %s922_s23, 32  ;;  %s1210_s1 = scalar_lea.vmem %s922_s23, 256 }
 0x1eb   :  { %p1207_p5 = scmp.ne.s32.totalorder %s922_s23, %s1206_s24  ;;  %p1211_p6 = scmp.lt.s32.totalorder %s922_s23, %s922_s23 }
 0x1ec   :  { %p1212_p7 = scmp.lt.s32.totalorder %s1210_s1, %s1206_s24 }
 0x1ee   :  { %p1213_p8 = por %p1212_p7, %p1211_p6 }
 0x1f0   :  { %p1214_p9 = pnand %p1213_p8, %p1207_p5 }
 0x1f2   :  { %1217 = shalt.err (!%p1214_p9)
}
 0x1f3   :  { %s1237_s4 = smov 32   ;;  %s1238_s25 = smov 2  }
 0x1f4   :  { %927 = dma.vmem_to_hbm [thread:$0]  %s922_s23, 32, %s1389_s5, [#allocation4], %s1237_s4, %s1237_s4, %s1238_s25  }
 0x1f5   :  { %1228 = dma.done.wait [#allocation4], 256  }
 0x1f6   :  { %1229 = vsyncadd [#allocation4], 4294967040 }
 0x1f7   :  { %931 = vsyncpa [#allocation3], 1 }
 0x1f8   :  { %932 = vsyncpa [#allocation4], 1 }

</bundles_post_ra>
